<compile_context>
chip_gen: v5e
topology: v5e:2x2
jax: 0.10.0
libtpu: 0.0.40
codegen_flags: <defaults>
</compile_context>

<pallas_src>
import functools

import jax
import jax.numpy as jnp
from jax.experimental import pallas as pl
from jax.experimental.pallas import tpu as pltpu

_EPS = 1e-8                       # torch.cosine_similarity default eps
_VMEM_LIMIT = 48 * 1024 * 1024    # <= ~48 MiB: safe on v7x (64 MiB/TC), roomy on v5e/v6e
_TILE = 512                       # node-row tile (multiple of 128)


def _round_up(n, m):
    return ((n + m - 1) // m) * m


def _pad_rows(x, rows):
    return jnp.pad(x, ((0, rows - x.shape[0]),) + ((0, 0),) * (x.ndim - 1))


def padded_node_count(max_nodes):
    return _round_up(max(int(max_nodes), 1), 128)


def pick_tile(n_pad):
    for t in (_TILE, 256, 128):
        if n_pad % t == 0:
            return t
    return 128


# --------------------------------------------------------------------------
# Static graph preprocessing — done ONCE at graph-construction time.
# Per dst node type: stacked bf16 adjacency (ne, n_pad, n_pad) and the
# precomputed inverse in-degree (n_pad, ne) used for the per-etype mean.
# --------------------------------------------------------------------------
def build_graph_tensors(adjs, canonical_etypes, ntypes, n_pad):
    graph = {}
    for nt in ntypes:
        dst_ets = [cet for cet in canonical_etypes if cet[2] == nt]
        ne = len(dst_ets)
        if ne == 0:
            graph[nt] = {"etypes": dst_ets, "adj": None, "invdeg": None}
            continue
        adj_stk = jnp.zeros((ne, n_pad, n_pad), jnp.bfloat16)
        invdeg = jnp.zeros((n_pad, ne), jnp.float32)
        for j, cet in enumerate(dst_ets):
            a = adjs[cet].astype(jnp.float32)
            nd, ns = a.shape
            adj_stk = adj_stk.at[j, :nd, :ns].set(a.astype(jnp.bfloat16))  # exact for 0/1
            deg = jnp.sum(a, axis=1)
            invdeg = invdeg.at[:nd, j].set(
                jnp.where(deg > 0, 1.0 / jnp.maximum(deg, 1.0), 0.0))
        graph[nt] = {"etypes": dst_ets, "adj": adj_stk, "invdeg": invdeg}
    return graph


# --------------------------------------------------------------------------
# Kernel 1: per NODE TYPE packed projection, one lane-dense slab output
#   slab = [ hr_u(etype 0) | ... | hr_u(etype k-1) | hr_msg | 1 | ht_u ]
# --------------------------------------------------------------------------
def _project_kernel(x_ref, w_ref, b_ref, slab_ref, *, k, d):
    # One lane-dense MXU matmul: (tn, Din) @ (Din, (k+1)*D); bias only on ht slice.
    h = jnp.dot(x_ref[...], w_ref[...], preferred_element_type=jnp.float32)

    def unit(v):  # v / max(||v||, eps) == v * rsqrt(max(||v||^2, eps^2))
        ss = jnp.sum(v * v, axis=1, keepdims=True)
        return v * jax.lax.rsqrt(jnp.maximum(ss, _EPS * _EPS))

    parts = [unit(h[:, j * d:(j + 1) * d]) for j in range(k)]        # hr_u per src-etype
    if k > 0:
        parts.append(h[:, (k - 1) * d:k * d])                        # hr message (last-etype quirk)
        parts.append(jnp.ones((h.shape[0], 1), jnp.float32))         # ones col -> row-sum via MXU
    parts.append(unit(h[:, k * d:(k + 1) * d] + b_ref[...]))         # ht_u (bias, then normalize)
    slab_ref[...] = jnp.concatenate(parts, axis=1) if len(parts) > 1 else parts[0]


def project_ntype(x_pad, we_t_list, wn_t, bn, *, tile):
    """x_pad:(Np,Din) f32; we_t_list: k x (Din,D); wn_t:(Din,D); bn:(D,)
       -> slab:(Np, k*D + (D+1 if k>0 else 0) + D), single lane-dense store."""
    k = len(we_t_list)
    n_pad, din = x_pad.shape
    d = wn_t.shape[1]
    w_packed = jnp.concatenate(list(we_t_list) + [wn_t], axis=1)      # (Din, (k+1)*D)
    b = bn.astype(jnp.float32).reshape(1, d)
    p_out = (k + 2) * d + 1 if k > 0 else d
    tn = min(tile, n_pad)
    kernel = functools.partial(_project_kernel, k=k, d=d)
    return pl.pallas_call(
        kernel,
        out_shape=jax.ShapeDtypeStruct((n_pad, p_out), jnp.float32),
        grid=(n_pad // tn,),
        in_specs=[pl.BlockSpec((tn, din), lambda i: (i, 0)),
                  pl.BlockSpec(w_packed.shape, lambda i: (0, 0)),
                  pl.BlockSpec((1, d), lambda i: (0, 0))],
        out_specs=pl.BlockSpec((tn, p_out), lambda i: (i, 0)),
        compiler_params=pltpu.CompilerParams(
            dimension_semantics=("parallel",),
            vmem_limit_bytes=_VMEM_LIMIT),
    )(x_pad, w_packed, b)


# --------------------------------------------------------------------------
# Kernel 2: per DST NODE TYPE — fused masked-cosine attention, per-etype
# aggregation (src axis tiled as a reduction grid dim) and cross-etype
# softmax combine.  grid = (dst tile [parallel], src tile ks [arbitrary]).
# Src slabs stay fully VMEM-resident (constant index map -> fetched once).
# --------------------------------------------------------------------------
def _aggregate_kernel(*refs, d, ne, n_slabs, htu_off, e_slab, e_hru_off, e_hrm_off):
    dst_slab_ref = refs[0]
    invdeg_ref = refs[1]
    adj_ref = refs[2]                       # (ne, tnd, tns) bf16 block
    src_slab_refs = refs[3:3 + n_slabs]     # full resident slabs
    out_ref = refs[3 + n_slabs]
    he_sc = refs[4 + n_slabs]               # (ne, tnd, d+1) f32 scratch

    ks = pl.program_id(1)
    tns = adj_ref.shape[2]
    row0 = pl.multiple_of(ks * tns, tns)

    @pl.when(ks == 0)
    def _():
        he_sc[...] = jnp.zeros_like(he_sc)

    # Normalized dst projection ht (etype-invariant), read once per dst tile.
    ht_u = dst_slab_ref[:, htu_off:htu_off + d]                        # (tnd, d)

    # Row block [row0, row0+tns) of each distinct VMEM-resident src slab.
    blks = [ref[pl.ds(row0, tns), :] for ref in src_slab_refs]

    for e in range(ne):
        blk = blks[e_slab[e]]
        hr_u = blk[:, e_hru_off[e]:e_hru_off[e] + d]                   # (tns, d), unit rows
        hrm1 = blk[:, e_hrm_off[e]:e_hrm_off[e] + d + 1]               # (tns, d+1) = [hr_msg | 1]
        # cosine similarity: rows of ht_u / hr_u are already unit-normalized
        s = jax.lax.dot_general(ht_u, hr_u, (((1,), (1,)), ((), ())),
                                preferred_element_type=jnp.float32)    # (tnd, tns)
        a_s = jnp.where(adj_ref[e] != 0, s, 0.0)
        # one MXU matmul yields both sum_u a_s*hr_msg and the row-sum of a_s (ones col)
        he_sc[e] += jnp.dot(a_s, hrm1, preferred_element_type=jnp.float32)

    @pl.when(ks == pl.num_programs(1) - 1)
    def _():
        inv = invdeg_ref[...]                                          # (tnd, ne)
        hes = [he_sc[e] for e in range(ne)]                            # (tnd, d+1) each
        ma = [hes[e][:, d:d + 1] * inv[:, e:e + 1] for e in range(ne)]  # mean attn per etype
        m = ma[0]
        for e in range(1, ne):
            m = jnp.maximum(m, ma[e])
        denom = jnp.zeros_like(m)
        acc = jnp.zeros(out_ref.shape, jnp.float32)
        for e in range(ne):
            p = jnp.exp(ma[e] - m)
            denom = denom + p
            acc = acc + p * hes[e][:, :d]
        out_ref[...] = (acc / denom).astype(out_ref.dtype)


def hgat_aggregate(dst_slab, invdeg, adj_stk, src_slabs, *, d, htu_off,
                   e_slab, e_hru_off, e_hrm_off, tile):
    ne, nd_pad, ns_pad = adj_stk.shape
    tnd = min(tile, nd_pad)
    tns = min(tile, ns_pad)
    n_slabs = len(src_slabs)
    kernel = functools.partial(
        _aggregate_kernel, d=d, ne=ne, n_slabs=n_slabs, htu_off=htu_off,
        e_slab=tuple(e_slab), e_hru_off=tuple(e_hru_off), e_hrm_off=tuple(e_hrm_off))
    in_specs = [pl.BlockSpec((tnd, dst_slab.shape[1]), lambda i, ks: (i, 0)),
                pl.BlockSpec((tnd, ne), lambda i, ks: (i, 0)),
                pl.BlockSpec((ne, tnd, tns), lambda i, ks: (0, i, ks))]
    in_specs += [pl.BlockSpec(s.shape, lambda i, ks: (0, 0)) for s in src_slabs]
    return pl.pallas_call(
        kernel,
        out_shape=jax.ShapeDtypeStruct((nd_pad, d), jnp.float32),
        grid=(nd_pad // tnd, ns_pad // tns),
        in_specs=in_specs,
        out_specs=pl.BlockSpec((tnd, d), lambda i, ks: (i, 0)),
        scratch_shapes=[pltpu.VMEM((ne, tnd, d + 1), jnp.float32)],
        compiler_params=pltpu.CompilerParams(
            dimension_semantics=("parallel", "arbitrary"),
            vmem_limit_bytes=_VMEM_LIMIT),
    )(dst_slab, invdeg, adj_stk, *src_slabs)


# --------------------------------------------------------------------------
# Full forward (glue in plain JAX, hot paths in the two kernels above)
# --------------------------------------------------------------------------
def hgat_forward(feat_dict, eweight, nweight, nbias, canonical_etypes, ntypes,
                 n_nodes, graph, n_pad):
    d_out = next(iter(nweight.values())).shape[0]
    tile = pick_tile(n_pad)

    # etypes for which each node type is the source, in canonical order; the
    # LAST one per src type supplies the message 'hr' (multi_update_all quirk).
    src_etypes = {nt: [e for (s, e, _dd) in canonical_etypes if s == nt] for nt in ntypes}

    # ---- Kernel 1: one packed, lane-dense projection slab per node type ----
    slabs, meta = {}, {}
    for nt in ntypes:
        ets = src_etypes[nt]
        k = len(ets)
        x_pad = _pad_rows(feat_dict[nt].astype(jnp.float32), n_pad)
        slabs[nt] = project_ntype(
            x_pad,
            [eweight[e].T.astype(jnp.float32) for e in ets],
            nweight[nt].T.astype(jnp.float32),
            nbias[nt],
            tile=tile)
        meta[nt] = {
            "hru_off": {e: j * d_out for j, e in enumerate(ets)},
            "hrm_off": k * d_out,                          # [hr_msg | 1] slice, width d+1
            "htu_off": (k + 1) * d_out + 1 if k > 0 else 0,
        }

    # ---- Kernel 2: fused attention + aggregation + softmax combine per dst -
    out = {}
    for nt in ntypes:
        g = graph[nt]
        dst_ets = g["etypes"]
        ne = len(dst_ets)
        if ne == 0:
            # Node type with no incoming canonical etype: nothing to aggregate.
            out[nt] = jnp.zeros((n_nodes[nt], d_out), jnp.float32)
            continue
        src_order, e_slab, e_hru_off, e_hrm_off = [], [], [], []
        for (s, e, _dd) in dst_ets:
            if s not in src_order:
                src_order.append(s)
            e_slab.append(src_order.index(s))
            e_hru_off.append(meta[s]["hru_off"][e])
            e_hrm_off.append(meta[s]["hrm_off"])
        out_pad = hgat_aggregate(
            slabs[nt], g["invdeg"], g["adj"], [slabs[s] for s in src_order],
            d=d_out, htu_off=meta[nt]["htu_off"],
            e_slab=e_slab, e_hru_off=e_hru_off, e_hrm_off=e_hrm_off, tile=tile)
        out[nt] = out_pad[:n_nodes[nt]]
    return out


# --------------------------------------------------------------------------
# Pure-JAX reference (same math) for validation
# --------------------------------------------------------------------------
def ref_forward(feat_dict, eweight, nweight, nbias, canonical_etypes, adjs, ntypes):
    hr_final = {}
    for (srct, etype, _dstt) in canonical_etypes:
        hr_final[srct] = feat_dict[srct] @ eweight[etype].T
    per_dst_h = {nt: [] for nt in ntypes}
    per_dst_ma = {nt: [] for nt in ntypes}
    for (srct, etype, dstt) in canonical_etypes:
        hr_s = feat_dict[srct] @ eweight[etype].T
        ht = feat_dict[dstt] @ nweight[dstt].T + nbias[dstt]
        hrn = jnp.maximum(jnp.linalg.norm(hr_s, axis=1, keepdims=True), _EPS)
        htn = jnp.maximum(jnp.linalg.norm(ht, axis=1, keepdims=True), _EPS)
        sim = (ht / htn) @ (hr_s / hrn).T
        A = adjs[(srct, etype, dstt)]
        a_s = A * sim
        deg = A.sum(axis=1, keepdims=True)
        per_dst_h[dstt].append(a_s @ hr_final[srct])
        per_dst_ma[dstt].append(jnp.where(deg > 0, a_s.sum(1, keepdims=True) / deg, 0.0))
    out = {}
    for nt in ntypes:
        H = jnp.stack(per_dst_h[nt], axis=0)                  # (E, N, D)
        MA = jnp.concatenate(per_dst_ma[nt], axis=1)          # (N, E)
        w = jax.nn.softmax(MA, axis=1)
        out[nt] = jnp.einsum('ne,end->nd', w, H)
    return out


# --------------------------------------------------------------------------
# Deterministic setup
# --------------------------------------------------------------------------
def xavier_normal(key, out_dim, in_dim, gain):
    std = gain * (2.0 / (in_dim + out_dim)) ** 0.5
    return std * jax.random.normal(key, (out_dim, in_dim), jnp.float32)


def make_adj(key, nd, ns):
    a = (jax.random.uniform(key, (nd, ns)) < 0.35).astype(jnp.float32)
    rows = jnp.arange(nd)
    a = a.at[rows, rows % ns].set(1.0)   # every dst node has >=1 in-edge per etype
    return a


if __name__ == "__main__":
    in_dim, out_dim = 32, 32
    n_vul, n_code = 16, 24
    ntypes = ["vul", "code"]
    etypes = ["cv1", "cv2", "vc", "cc"]
    canonical_etypes = [
        ("code", "cv1", "vul"),
        ("code", "cv2", "vul"),
        ("vul", "vc", "code"),
        ("code", "cc", "code"),
    ]
    n_nodes = {"vul": n_vul, "code": n_code}

    key = jax.random.PRNGKey(0)
    keys = iter(jax.random.split(key, 64))
    gain = 2.0 ** 0.5  # nn.init.calculate_gain('relu')

    feat_dict = {nt: jax.random.normal(next(keys), (n_nodes[nt], in_dim), jnp.float32)
                 for nt in ntypes}
    eweight = {et: xavier_normal(next(keys), out_dim, in_dim, gain) for et in etypes}
    nweight = {nt: xavier_normal(next(keys), out_dim, in_dim, gain) for nt in ntypes}
    bound = 1.0 / (in_dim ** 0.5)  # torch Linear default bias init (not re-initialized)
    nbias = {nt: jax.random.uniform(next(keys), (out_dim,), jnp.float32, -bound, bound)
             for nt in ntypes}
    adjs = {cet: make_adj(next(keys), n_nodes[cet[2]], n_nodes[cet[0]])
            for cet in canonical_etypes}

    # Static graph preprocessing (adjacency pad/stack + inverse degree): once.
    n_pad = padded_node_count(max(n_nodes.values()))
    graph = build_graph_tensors(adjs, canonical_etypes, ntypes, n_pad)

    out = hgat_forward(feat_dict, eweight, nweight, nbias, canonical_etypes,
                       ntypes, n_nodes, graph, n_pad)
    out = {kk: jax.block_until_ready(v) for kk, v in out.items()}

    ref = ref_forward(feat_dict, eweight, nweight, nbias, canonical_etypes, adjs, ntypes)
    for nt in ntypes:
        assert out[nt].shape == (n_nodes[nt], out_dim)
        assert jnp.allclose(out[nt], ref[nt], atol=2e-4, rtol=2e-3), f"mismatch for {nt}"

    print("KERNEL_OK")
</pallas_src>

<mosaic_0001>
module attributes {stable_mosaic.version = 11 : i64} {
  func.func @_project_kernel(%arg0: i32, %arg1: memref<128x32xf32, #tpu.memory_space<vmem>>, %arg2: memref<32x64xf32, #tpu.memory_space<vmem>>, %arg3: memref<1x32xf32, #tpu.memory_space<vmem>>, %arg4: memref<128x97xf32, #tpu.memory_space<vmem>>) attributes {dimension_semantics = [#tpu.dimension_semantics<parallel>], iteration_bounds = array<i64: 1>, scalar_prefetch = 0 : i64, scratch_operands = 0 : i64, tpu.core_type = #tpu.core_type<tc>, window_params = [{transform_indices = @transform_0, window_bounds = array<i64: 128, 32>}, {pipeline_mode = #tpu.pipeline_mode<synchronous>, transform_indices = @transform_1, window_bounds = array<i64: 32, 64>}, {pipeline_mode = #tpu.pipeline_mode<synchronous>, transform_indices = @transform_2, window_bounds = array<i64: 1, 32>}, {transform_indices = @transform_3, window_bounds = array<i64: 128, 97>}]} {
    %c0 = arith.constant 0 : index
    %c0_0 = arith.constant 0 : index
    %0 = vector.load %arg1[%c0, %c0_0] : memref<128x32xf32, #tpu.memory_space<vmem>>, vector<128x32xf32>
    %c0_1 = arith.constant 0 : index
    %c0_2 = arith.constant 0 : index
    %1 = vector.load %arg2[%c0_1, %c0_2] : memref<32x64xf32, #tpu.memory_space<vmem>>, vector<32x64xf32>
    %cst = arith.constant dense<0.000000e+00> : vector<128x64xf32>
    %2 = tpu.matmul %0, %1, %cst {dimension_numbers = #tpu.dot_dimension_numbers<[1], [0], [0], [1], [0, 0, 1, 1], [], []>} : vector<128x32xf32>, vector<32x64xf32>, vector<128x64xf32> -> vector<128x64xf32>
    %3 = vector.extract_strided_slice %2 {offsets = [0, 0], sizes = [128, 32], strides = [1, 1]} : vector<128x64xf32> to vector<128x32xf32>
    %4 = arith.mulf %3, %3 : vector<128x32xf32>
    %cst_3 = arith.constant dense<0.000000e+00> : vector<128xf32>
    %5 = vector.multi_reduction <add>, %4, %cst_3 [1] : vector<128x32xf32> to vector<128xf32>
    %6 = vector.shape_cast %5 : vector<128xf32> to vector<128x1xf32>
    %cst_4 = arith.constant 1.000000e-16 : f32
    %7 = vector.broadcast %cst_4 : f32 to vector<128x1xf32>
    %8 = arith.maximumf %6, %7 : vector<128x1xf32>
    %9 = math.rsqrt %8 : vector<128x1xf32>
    %10 = vector.broadcast %9 : vector<128x1xf32> to vector<128x32xf32>
    %11 = arith.mulf %3, %10 : vector<128x32xf32>
    %12 = vector.extract_strided_slice %2 {offsets = [0, 0], sizes = [128, 32], strides = [1, 1]} : vector<128x64xf32> to vector<128x32xf32>
    %cst_5 = arith.constant 1.000000e+00 : f32
    %13 = vector.broadcast %cst_5 : f32 to vector<128x1xf32>
    %14 = vector.extract_strided_slice %2 {offsets = [0, 32], sizes = [128, 32], strides = [1, 1]} : vector<128x64xf32> to vector<128x32xf32>
    %c0_6 = arith.constant 0 : index
    %c0_7 = arith.constant 0 : index
    %15 = vector.load %arg3[%c0_6, %c0_7] : memref<1x32xf32, #tpu.memory_space<vmem>>, vector<1x32xf32>
    %16 = vector.broadcast %15 : vector<1x32xf32> to vector<128x32xf32>
    %17 = arith.addf %14, %16 : vector<128x32xf32>
    %18 = arith.mulf %17, %17 : vector<128x32xf32>
    %cst_8 = arith.constant dense<0.000000e+00> : vector<128xf32>
    %19 = vector.multi_reduction <add>, %18, %cst_8 [1] : vector<128x32xf32> to vector<128xf32>
    %20 = vector.shape_cast %19 : vector<128xf32> to vector<128x1xf32>
    %cst_9 = arith.constant 1.000000e-16 : f32
    %21 = vector.broadcast %cst_9 : f32 to vector<128x1xf32>
    %22 = arith.maximumf %20, %21 : vector<128x1xf32>
    %23 = math.rsqrt %22 : vector<128x1xf32>
    %24 = vector.broadcast %23 : vector<128x1xf32> to vector<128x32xf32>
    %25 = arith.mulf %17, %24 : vector<128x32xf32>
    %26 = tpu.concatenate %11, %12, %13, %25 in 1 : vector<128x32xf32>, vector<128x32xf32>, vector<128x1xf32>, vector<128x32xf32> -> vector<128x97xf32>
    %c0_10 = arith.constant 0 : index
    %c0_11 = arith.constant 0 : index
    %27 = vector.load %arg4[%c0_10, %c0_11] : memref<128x97xf32, #tpu.memory_space<vmem>>, vector<128x97xf32>
    tpu.vector_store %arg4[%c0_10, %c0_11], %26 {strides = array<i32>} : memref<128x97xf32, #tpu.memory_space<vmem>>, vector<128x97xf32>,
    return
  }
  func.func @transform_0(%arg0: i32) -> (i32, i32) {
    %c0_i32 = arith.constant 0 : i32
    %c0_i32_0 = arith.constant 0 : i32
    return %arg0, %c0_i32 : i32, i32
  }
  func.func @transform_1(%arg0: i32) -> (i32, i32) {
    %c0_i32 = arith.constant 0 : i32
    %c0_i32_0 = arith.constant 0 : i32
    %c0_i32_1 = arith.constant 0 : i32
    return %c0_i32, %c0_i32_0 : i32, i32
  }
  func.func @transform_2(%arg0: i32) -> (i32, i32) {
    %c0_i32 = arith.constant 0 : i32
    %c0_i32_0 = arith.constant 0 : i32
    %c0_i32_1 = arith.constant 0 : i32
    return %c0_i32, %c0_i32_0 : i32, i32
  }
  func.func @transform_3(%arg0: i32) -> (i32, i32) {
    %c0_i32 = arith.constant 0 : i32
    %c0_i32_0 = arith.constant 0 : i32
    return %arg0, %c0_i32 : i32, i32
  }
}

</mosaic_0001>

<bundles_post_ra>
// kernel: tpu_custom_call.1
= control target key start
LH: loop header
LB: loop body
LE: loop exit
PB: predicated region body
PF: predicated region fallthrough
CT: control target
= control target key end

     0   :  { %s1041_s22 = smov 32   ;;  %vm34_vm0 = vcmask 261120   ;;  %s1658_s1 = inlined_call_operand.vmem [shape: f32[32,64], index: 1, kind: input, shape index: {}]   ;;  %s1659_s2 = inlined_call_operand.vmem [shape: f32[1,32], index: 2, kind: input, shape index: {}]   ;;  %s1660_s0 = inlined_call_operand.vmem [shape: f32[128,32], index: 0, kind: input, shape index: {}]   ;;  %s1661_s3 = inlined_call_operand.vmem [shape: f32[128,97], index: 3, kind: output, shape index: {}]  }
   0x1   :  { %v33_v0 = vld [vmem:[%s1658_s1 + $0x18] sm:$0xff]  ;;  %v32_v1 = vld [vmem:[%s1658_s1 + $0x10] sm:$0xff]  ;;  %v31_v2 = vld [vmem:[%s1658_s1 + $0x8] sm:$0xff] }
   0x2   :  { %95 = vmatpush.msra.mxu0 %v33_v0  ;;  %961 = vmatpush.msra.mxu1 %v33_v0  ;;  %v976_v3 = vld [vmem:[%s1659_s2] ss:$0 sm:$0xff]  ;;  %v15_v9 = vld [vmem:[%s1660_s0 + $0x8] sm:$0xff]  ;;  %v16_v13 = vld [vmem:[%s1660_s0 + $0x10] sm:$0xff] }
   0x3   :  { %962 = vmatpush.msra.mxu2 %v33_v0  ;;  %963 = vmatpush.msra.mxu3 %v33_v0  ;;  %v30_v4 = vld [vmem:[%s1658_s1] sm:$0xff]  ;;  %v19_v10 = vld [vmem:[%s1660_s0 + $0x28] sm:$0xff]  ;;  %v24_v14 = vld [vmem:[%s1660_s0 + $0x50] sm:$0xff] }
   0x4   :  { %96 = vmatpush.msra.mxu0 %v32_v1  ;;  %964 = vmatpush.msra.mxu1 %v32_v1  ;;  %v14_v5 = vld [vmem:[%s1660_s0] sm:$0xff]  ;;  %v23_v11 = vld [vmem:[%s1660_s0 + $0x48] sm:$0xff]  ;;  %v20_v15 = vld [vmem:[%s1660_s0 + $0x30] sm:$0xff] }
   0x5   :  { %965 = vmatpush.msra.mxu2 %v32_v1  ;;  %407 = vrot.lane.b32.xlu1 %v976_v3, %s1041_s22  ;;  %v18_v6 = vld [vmem:[%s1660_s0 + $0x20] sm:$0xff]  ;;  %v27_v12 = vld [vmem:[%s1660_s0 + $0x68] sm:$0xff]  ;;  %v28_v16 = vld [vmem:[%s1660_s0 + $0x70] sm:$0xff] }
   0x6   :  { %97 = vmatpush.msra.mxu0 %v31_v2  ;;  %967 = vmatpush.msra.mxu1 %v31_v2  ;;  %v22_v7 = vld [vmem:[%s1660_s0 + $0x40] sm:$0xff]  ;;  %v17_v17 = vld [vmem:[%s1660_s0 + $0x18] sm:$0xff] }
   0x7   :  { %968 = vmatpush.msra.mxu2 %v31_v2  ;;  %966 = vmatpush.msra.mxu3 %v32_v1  ;;  %v26_v8 = vld [vmem:[%s1660_s0 + $0x60] sm:$0xff]  ;;  %v25_v18 = vld [vmem:[%s1660_s0 + $0x58] sm:$0xff] }
   0x8   :  { %98 = vmatpush.msra.mxu0 %v30_v4  ;;  %970 = vmatpush.msra.mxu1 %v30_v4  ;;  %v21_v19 = vld [vmem:[%s1660_s0 + $0x38] sm:$0xff] }
   0x9   :  { %971 = vmatpush.msra.mxu2 %v30_v4  ;;  %945 = vmatmul.msk.f32.vlgmr.msra.gmra.mxu0 %vm34_vm0, %v14_v5  ;;  %v29_v20 = vld [vmem:[%s1660_s0 + $0x78] sm:$0xff]  ;;  %s1042_s0 = smov 96  }
   0xa   :  { %949 = vmatmul.msk.f32.vlgmr.msra.gmra.mxu1 %vm34_vm0, %v18_v6  ;;  %953 = vmatmul.msk.f32.vlgmr.msra.gmra.mxu2 %vm34_vm0, %v22_v7 }
   0xb   :  { %969 = vmatpush.msra.mxu3 %v31_v2 }
   0xd   :  { %972 = vmatpush.msra.mxu3 %v30_v4 }
   0xe   :  { %957 = vmatmul.msk.f32.vlgmr.msra.gmra.mxu3 %vm34_vm0, %v26_v8 }
  0x11   :  { %946 = vmatmul.msk.f32.gmra.mxu0 %vm34_vm0, %v15_v9 }
  0x12   :  { %950 = vmatmul.msk.f32.gmra.mxu1 %vm34_vm0, %v19_v10  ;;  %954 = vmatmul.msk.f32.gmra.mxu2 %vm34_vm0, %v23_v11 }
  0x16   :  { %958 = vmatmul.msk.f32.gmra.mxu3 %vm34_vm0, %v27_v12 }
  0x19   :  { %947 = vmatmul.msk.f32.gmra.mxu0 %vm34_vm0, %v16_v13 }
  0x1a   :  { %955 = vmatmul.msk.f32.gmra.mxu2 %vm34_vm0, %v24_v14  ;;  %951 = vmatmul.msk.f32.gmra.mxu1 %vm34_vm0, %v20_v15 }
  0x1e   :  { %959 = vmatmul.msk.f32.gmra.mxu3 %vm34_vm0, %v28_v16 }
  0x21   :  { %948 = vmatmul.msk.f32.gmra.mxu0 %vm34_vm0, %v17_v17 }
  0x22   :  { %956 = vmatmul.msk.f32.gmra.mxu2 %vm34_vm0, %v25_v18  ;;  %952 = vmatmul.msk.f32.gmra.mxu1 %vm34_vm0, %v21_v19 }
  0x26   :  { %960 = vmatmul.msk.f32.gmra.mxu3 %vm34_vm0, %v29_v20 }
  0x77   :  { %v1164_v27 = vpop.permute.xlu1 %407 }
  0x86   :  { %v1144_v21 = vpop.f32.mrf.mxu0 }
  0x87   :  { %v1146_v22 = vpop.f32.mrf.mxu1  ;;  %762 = vrot.lane.b32.xlu2 %v1144_v21, %s1041_s22  ;;  %v148_v32 = vmul.f32 %v1144_v21, %v1144_v21  ;;  %v1187_v35 = vadd.f32 %v1164_v27, %v1144_v21 }
  0x88   :  { %770 = vrot.lane.b32.xlu0 %v1146_v22, %s1041_s22  ;;  %v152_v30 = vmul.f32 %v1146_v22, %v1146_v22  ;;  %v1183_v34 = vadd.f32 %v1164_v27, %v1146_v22 }
  0x89   :  { %v164_v33 = vsel %vm34_vm0, %v148_v32, 0.0  ;;  %v426_v37 = vmul.f32 %v1187_v35, %v1187_v35 }
  0x8a   :  { %v176_v31 = vsel %vm34_vm0, %v152_v30, 0.0  ;;  %v430_v36 = vmul.f32 %v1183_v34, %v1183_v34 }
  0x8d   :  { %v1152_v23 = vpop.f32.mrf.mxu2 }
  0x8e   :  { %778 = vrot.lane.b32.xlu1 %v1152_v23, %s1041_s22  ;;  %v1156_v24 = vpop.f32.mrf.mxu0  ;;  %v156_v47 = vmul.f32 %v1152_v23, %v1152_v23  ;;  %v1228_v52 = vadd.f32 %v1164_v27, %v1152_v23 }
  0x8f   :  { %v1160_v25 = vpop.f32.mrf.mxu1  ;;  %v149_v46 = vmul.f32 %v1156_v24, %v1156_v24  ;;  %v1222_v50 = vadd.f32 %v1164_v27, %v1156_v24 }
  0x90   :  { %v188_v49 = vsel %vm34_vm0, %v156_v47, 0.0  ;;  %v434_v55 = vmul.f32 %v1228_v52, %v1228_v52  ;;  %v153_v12 = vmul.f32 %v1160_v25, %v1160_v25 }
  0x91   :  { %v1162_v26 = vpop.f32.mrf.mxu3  ;;  %v167_v48 = vsel %vm34_vm0, %v149_v46, 0.0  ;;  %v427_v51 = vmul.f32 %v1222_v50, %v1222_v50 }
  0x92   :  { %v1170_v28 = vadd.f32 %v1164_v27, %v1162_v26  ;;  %v160_v44 = vmul.f32 %v1162_v26, %v1162_v26  ;;  %v179_v20 = vsel %vm34_vm0, %v153_v12, 0.0 }
  0x94   :  { %v438_v29 = vmul.f32 %v1170_v28, %v1170_v28  ;;  %v200_v45 = vsel %vm34_vm0, %v160_v44, 0.0 }
  0x95   :  { %v1202_v41 = vpop.f32.mrf.mxu2 }
  0x96   :  { %764 = vrot.lane.b32.xlu1 %v1156_v24, %s1041_s22  ;;  %v1206_v42 = vadd.f32 %v1164_v27, %v1202_v41  ;;  %v1230_v53 = vpop.f32.mrf.mxu0 }
  0x97   :  { %v150_v54 = vmul.f32 %v1230_v53, %v1230_v53  ;;  %v1243_v61 = vpop.f32.mrf.mxu1 }
  0x98   :  { %v435_v43 = vmul.f32 %v1206_v42, %v1206_v42  ;;  %v1247_v63 = vadd.f32 %v1164_v27, %v1243_v61 }
  0x99   :  { %v1194_v38 = vpop.f32.mrf.mxu3  ;;  %v170_v56 = vsel %vm34_vm0, %v150_v54, 0.0 }
  0x9a   :  { %v161_v39 = vmul.f32 %v1194_v38, %v1194_v38  ;;  %v432_v1 = vmul.f32 %v1247_v63, %v1247_v63 }
  0x9c   :  { %v203_v40 = vsel %vm34_vm0, %v161_v39, 0.0  ;;  %v1285_v39 = vadd.f32 %v1164_v27, %v1194_v38 }
  0x9e   :  { %772 = vrot.lane.b32.xlu1 %v1160_v25, %s1041_s22 }
  0xa1   :  { %v1252_v9 = vpop.f32.mrf.mxu3 }
  0xa2   :  { %1663 = vst [vmem:[#allocation2_spill] sm:$0xff] %v1252_v9 }
  0xa6   :  { %482 = vrot.lane.b32.xlu1 %v438_v29, %s1042_s0 }
  0xb0   :  { %177 = vadd.xlane.f32.xlu2 %v176_v31 }
  0xb2   :  { %165 = vadd.xlane.f32.xlu0 %v164_v33  ;;  %v157_v33 = vmul.f32 %v1202_v41, %v1202_v41 }
  0xc6   :  { %466 = vrot.lane.b32.xlu0 %v430_v36, %s1042_s0 }
  0xc8   :  { %458 = vrot.lane.b32.xlu2 %v426_v37, %s1042_s0 }
  0xd0   :  { %204 = vadd.xlane.f32.xlu1 %v203_v40  ;;  %786 = vrot.lane.b32.xlu2 %v1162_v26, %s1041_s22 }
  0xe1   :  { %v763_v57 = vpop.permute.xlu2 %762 }
  0xe9   :  { %476 = vrot.lane.b32.xlu1 %v435_v43, %s1042_s0  ;;  %v1289_v43 = vpop.f32.mrf.mxu2 }
  0xea   :  { %v158_v44 = vmul.f32 %v1289_v43, %v1289_v43 }
  0xec   :  { %v194_v47 = vsel %vm34_vm0, %v158_v44, 0.0 }
  0xf0   :  { %201 = vadd.xlane.f32.xlu0 %v200_v45  ;;  %v439_v45 = vmul.f32 %v1285_v39, %v1285_v39 }
  0xf8   :  { %168 = vadd.xlane.f32.xlu0 %v167_v48  ;;  %v1301_v48 = vpop.f32.mrf.mxu0 }
  0xf9   :  { %189 = vadd.xlane.f32.xlu2 %v188_v49 }
  0xfa   :  { %v771_v58 = vpop.permute.xlu0 %770 }
 0x100   :  { %v1258_v15 = vpop.permute.xlu1 %778 }
 0x108   :  { %v1269_v32 = vpop.permute.xlu1 %764 }
 0x10c   :  { %460 = vrot.lane.b32.xlu0 %v427_v51, %s1042_s0  ;;  %v151_v51 = vmul.f32 %v1301_v48, %v1301_v48 }
 0x110   :  { %v1274_v36 = vpop.permute.xlu1 %772 }
 0x111   :  { %474 = vrot.lane.b32.xlu2 %v434_v55, %s1042_s0 }
 0x113   :  { %171 = vadd.xlane.f32.xlu1 %v170_v56  ;;  %v173_v56 = vsel %vm34_vm0, %v151_v51, 0.0 }
 0x114   :  { %788 = vrot.lane.b32.xlu0 %v1194_v38, %s1041_s22 }
 0x118   :  { %v1287_v40 = vpop.permute.xlu1 %482 }
 0x11c   :  { %766 = vrot.lane.b32.xlu0 %v1230_v53, %s1041_s22 }
 0x123   :  { %v178_v59 = vpop.xlane.xlu2 %177 }
 0x124   :  { %v216_v60 = vmax.f32 %v178_v59, 1e-16  ;;  %v1312_v59 = vpop.f32.mrf.mxu1 }
 0x125   :  { %v166_v62 = vpop.xlane.xlu0 %165 }
 0x126   :  { %977 = vrsqrt.f32 %v216_v60  ;;  %v212_v0 = vmax.f32 %v166_v62, 1e-16  ;;  %vm274_vm2 = vweird.f32 %v216_v60 }
 0x128   :  { %979 = vrsqrt.f32 %v212_v0  ;;  %vm234_vm5 = vweird.f32 %v212_v0 }
 0x12c   :  { %v978_v2 = vpop.eup %977  ;;  %470 = vrot.lane.b32.xlu1 %v432_v1, %s1042_s0 }
 0x12d   :  { %v269_v3 = vmul.f32 %v978_v2, %v216_v60  ;;  %vm275_vm1 = vweird.f32 %v978_v2  ;;  %v155_v60 = vmul.f32 %v1312_v59, %v1312_v59 }
 0x12e   :  { %v980_v4 = vpop.eup %979  ;;  %vm276_vm4 = vmor %vm274_vm2, %vm275_vm1 }
 0x12f   :  { %v270_v5 = vmul.f32 %v978_v2, %v269_v3  ;;  %v229_v6 = vmul.f32 %v980_v4, %v212_v0  ;;  %vm235_vm3 = vweird.f32 %v980_v4  ;;  %v185_v1 = vsel %vm34_vm0, %v155_v60, 0.0 }
 0x130   :  { %vm236_vm6 = vmor %vm234_vm5, %vm235_vm3 }
 0x131   :  { %v271_v7 = vmul.f32 0.5, %v270_v5  ;;  %v230_v8 = vmul.f32 %v980_v4, %v229_v6  ;;  %v1320_v5 = vpop.permute.xlu2 %458 }
 0x133   :  { %v272_v10 = vsub.f32 1.5, %v271_v7  ;;  %v231_v11 = vmul.f32 0.5, %v230_v8 }
 0x134   :  { %790 = vrot.lane.b32.xlu1 %v1252_v9, %s1041_s22 }
 0x135   :  { %v273_v13 = vmul.f32 %v978_v2, %v272_v10  ;;  %v232_v14 = vsub.f32 1.5, %v231_v11 }
 0x137   :  { %v277_v16 = vsel %vm276_vm4, %v978_v2, %v273_v13  ;;  %v233_v17 = vmul.f32 %v980_v4, %v232_v14 }
 0x138   :  { %v392_v18 = vmul.f32 %v277_v16, %v1146_v22  ;;  %v191_v22 = vsel %vm34_vm0, %v157_v33, 0.0  ;;  %v1298_v46 = vpop.permute.xlu0 %466 }
 0x139   :  { %v237_v19 = vsel %vm236_vm6, %v980_v4, %v233_v17  ;;  %v787_v17 = vpop.permute.xlu2 %786 }
 0x13a   :  { %v388_v29 = vmul.f32 %v237_v19, %v1144_v21  ;;  %180 = vadd.xlane.f32.xlu2 %v179_v20  ;;  %v1264_v30 = vsel %vm34_vm0, %v392_v18, %v771_v58  ;;  %v1278_v21 = vadd.f32 %v1164_v27, %v1160_v25 }
 0x13c   :  { %v1267_v31 = vsel %vm34_vm0, %v388_v29, %v763_v57  ;;  %v431_v37 = vmul.f32 %v1278_v21, %v1278_v21  ;;  %v1310_v57 = vadd.f32 %v1164_v27, %v1230_v53 }
 0x13e   :  { %v428_v62 = vmul.f32 %v1310_v57, %v1310_v57 }
 0x143   :  { %v205_v49 = vpop.xlane.xlu1 %204 }
 0x144   :  { %v225_v54 = vmax.f32 %v205_v49, 1e-16 }
 0x146   :  { %192 = vadd.xlane.f32.xlu0 %v191_v22  ;;  %981 = vrsqrt.f32 %v225_v54  ;;  %vm364_vm10 = vweird.f32 %v225_v54  ;;  %v154_v22 = vmul.f32 %v1243_v61, %v1243_v61 }
 0x148   :  { %v182_v44 = vsel %vm34_vm0, %v154_v22, 0.0 }
 0x14c   :  { %v982_v0 = vpop.eup %981 }
 0x14d   :  { %v359_v4 = vmul.f32 %v982_v0, %v225_v54  ;;  %vm365_vm11 = vweird.f32 %v982_v0 }
 0x14e   :  { %vm366_vm12 = vmor %vm364_vm10, %vm365_vm11 }
 0x14f   :  { %v360_v8 = vmul.f32 %v982_v0, %v359_v4  ;;  %v162_v4 = vmul.f32 %v1252_v9, %v1252_v9 }
 0x151   :  { %v361_v12 = vmul.f32 0.5, %v360_v8 }
 0x152   :  { %468 = vrot.lane.b32.xlu2 %v431_v37, %s1042_s0  ;;  %v1338_v37 = vadd.f32 %v1164_v27, %v1301_v48 }
 0x153   :  { %v362_v18 = vsub.f32 1.5, %v361_v12 }
 0x155   :  { %v363_v20 = vmul.f32 %v982_v0, %v362_v18 }
 0x15a   :  { %484 = vrot.lane.b32.xlu0 %v439_v45, %s1042_s0  ;;  %780 = vrot.lane.b32.xlu2 %v1202_v41, %s1041_s22 }
 0x15b   :  { %v1330_v29 = vpop.permute.xlu1 %476 }
 0x15e   :  { %195 = vadd.xlane.f32.xlu1 %v194_v47  ;;  %v429_v47 = vmul.f32 %v1338_v37, %v1338_v37 }
 0x162   :  { %774 = vrot.lane.b32.xlu2 %v1243_v61, %s1041_s22 }
 0x163   :  { %v202_v55 = vpop.xlane.xlu0 %201 }
 0x164   :  { %v224_v58 = vmax.f32 %v202_v55, 1e-16 }
 0x166   :  { %983 = vrsqrt.f32 %v224_v58  ;;  %174 = vadd.xlane.f32.xlu1 %v173_v56  ;;  %vm354_vm8 = vweird.f32 %v224_v58  ;;  %v1348_v56 = vpop.f32.mrf.mxu2 }
 0x16a   :  { %462 = vrot.lane.b32.xlu2 %v428_v62, %s1042_s0 }
 0x16b   :  { %v1324_v13 = vpop.xlane.xlu0 %168 }
 0x16c   :  { %v984_v2 = vpop.eup %983 }
 0x16d   :  { %v349_v3 = vmul.f32 %v984_v2, %v224_v58  ;;  %vm355_vm7 = vweird.f32 %v984_v2  ;;  %v1350_v58 = vpop.f32.mrf.mxu3 }
 0x16e   :  { %186 = vadd.xlane.f32.xlu1 %v185_v1  ;;  %vm356_vm9 = vmor %vm354_vm8, %vm355_vm7  ;;  %v1356_v62 = vadd.f32 %v1164_v27, %v1350_v58 }
 0x16f   :  { %v350_v6 = vmul.f32 %v984_v2, %v349_v3 }
 0x171   :  { %v351_v7 = vmul.f32 0.5, %v350_v6 }
 0x172   :  { %768 = vrot.lane.b32.xlu2 %v1301_v48, %s1041_s22 }
 0x173   :  { %v352_v10 = vsub.f32 1.5, %v351_v7 }
 0x175   :  { %v353_v11 = vmul.f32 %v984_v2, %v352_v10  ;;  %v206_v10 = vsel %vm34_vm0, %v162_v4, 0.0 }
 0x177   :  { %v357_v14 = vsel %vm356_vm9, %v984_v2, %v353_v11  ;;  %v441_v2 = vmul.f32 %v1356_v62, %v1356_v62  ;;  %v1366_v11 = vpop.xlane.xlu2 %189 }
 0x178   :  { %v400_v16 = vmul.f32 %v357_v14, %v1162_v26  ;;  %v367_v26 = vsel %vm366_vm12, %v982_v0, %v363_v20  ;;  %v1387_v20 = vadd.f32 %v1164_v27, %v1252_v9 }
 0x179   :  { %v401_v45 = vmul.f32 %v367_v26, %v1194_v38 }
 0x17a   :  { %v1328_v19 = vsel %vm34_vm0, %v400_v16, %v787_v17  ;;  %v1376_v16 = vadd.f32 %v1164_v27, %v1289_v43 }
 0x17c   :  { %v436_v18 = vmul.f32 %v1376_v16, %v1376_v16 }
 0x17e   :  { %v1332_v33 = vpop.permute.xlu0 %460 }
 0x17f   :  { %v475_v17 = vpop.permute.xlu2 %474 }
 0x184   :  { %183 = vadd.xlane.f32.xlu0 %v182_v44  ;;  %v440_v44 = vmul.f32 %v1387_v20, %v1387_v20 }
 0x186   :  { %v789_v49 = vpop.permute.xlu0 %788  ;;  %v172_v51 = vpop.xlane.xlu1 %171 }
 0x187   :  { %v1345_v54 = vsel %vm34_vm0, %v401_v45, %v789_v49  ;;  %v214_v55 = vmax.f32 %v172_v51, 1e-16  ;;  %464 = vrot.lane.b32.xlu1 %v429_v47, %s1042_s0 }
 0x188   :  { %1664 = vst [vmem:[#allocation3_spill] sm:$0xff] %v1345_v54 }
 0x189   :  { %985 = vrsqrt.f32 %v214_v55  ;;  %vm254_vm13 = vweird.f32 %v214_v55 }
 0x18e   :  { %v767_v7 = vpop.permute.xlu0 %766 }
 0x18f   :  { %v986_v60 = vpop.eup %985  ;;  %784 = vrot.lane.b32.xlu1 %v1348_v56, %s1041_s22 }
 0x190   :  { %v249_v38 = vmul.f32 %v986_v60, %v214_v55  ;;  %vm255_vm14 = vweird.f32 %v986_v60 }
 0x191   :  { %vm256_vm15 = vmor %vm254_vm13, %vm255_vm14 }
 0x192   :  { %v250_v0 = vmul.f32 %v986_v60, %v249_v38 }
 0x194   :  { %v251_v1 = vmul.f32 0.5, %v250_v0 }
 0x196   :  { %v252_v3 = vsub.f32 1.5, %v251_v1 }
 0x197   :  { %488 = vrot.lane.b32.xlu1 %v441_v2, %s1042_s0 }
 0x198   :  { %v253_v6 = vmul.f32 %v986_v60, %v252_v3  ;;  %782 = vrot.lane.b32.xlu0 %v1289_v43, %s1041_s22 }
 0x19a   :  { %v257_v8 = vsel %vm256_vm15, %v986_v60, %v253_v6  ;;  %v530_v60 = vsel %vm34_vm0, %v475_v17, 0.0 }
 0x19b   :  { %v390_v12 = vmul.f32 %v257_v8, %v1230_v53  ;;  %207 = vadd.xlane.f32.xlu2 %v206_v10  ;;  %v1383_v53 = vadd.f32 %v1164_v27, %v1312_v59 }
 0x19d   :  { %v1370_v14 = vsel %vm34_vm0, %v390_v12, %v767_v7  ;;  %v433_v26 = vmul.f32 %v1383_v53, %v1383_v53 }
 0x19e   :  { %v471_v55 = vpop.permute.xlu1 %470 }
 0x1a0   :  { %776 = vrot.lane.b32.xlu0 %v1312_v59, %s1041_s22 }
 0x1a6   :  { %v1402_v4 = vpop.permute.xlu1 %790 }
 0x1a7   :  { %1665 = vst [vmem:[#allocation4_spill] sm:$0xff] %v1402_v4 }
 0x1a8   :  { %478 = vrot.lane.b32.xlu0 %v436_v18, %s1042_s0 }
 0x1ad   :  { %v1389_v22 = vpop.xlane.xlu2 %180 }
 0x1b0   :  { %472 = vrot.lane.b32.xlu0 %v433_v26, %s1042_s0 }
 0x1b3   :  { %486 = vrot.lane.b32.xlu2 %v440_v44, %s1042_s0 }
 0x1b5   :  { %v469_v45 = vpop.permute.xlu2 %468 }
 0x1b6   :  { %v521_v6 = vsel %vm34_vm0, %v469_v45, 0.0  ;;  %v163_v45 = vmul.f32 %v1350_v58, %v1350_v58 }
 0x1b9   :  { %v193_v47 = vpop.xlane.xlu0 %192 }
 0x1ba   :  { %v221_v49 = vmax.f32 %v193_v47, 1e-16 }
 0x1bb   :  { %792 = vrot.lane.b32.xlu2 %v1350_v58, %s1041_s22  ;;  %s1043_s22 = smov 33  }
 0x1bc   :  { %987 = vrsqrt.f32 %v221_v49  ;;  %vm324_vm2 = vweird.f32 %v221_v49 }
 0x1bd   :  { %v781_v51 = vpop.permute.xlu2 %780 }
 0x1c1   :  { %531 = vadd.xlane.f32.xlu1 %v530_v60  ;;  %v209_v60 = vsel %vm34_vm0, %v163_v45, 0.0 }
 0x1c2   :  { %v988_v38 = vpop.eup %987 }
 0x1c3   :  { %v319_v0 = vmul.f32 %v988_v38, %v221_v49  ;;  %vm325_vm1 = vweird.f32 %v988_v38  ;;  %v159_v49 = vmul.f32 %v1348_v56, %v1348_v56 }
 0x1c4   :  { %vm326_vm3 = vmor %vm324_vm2, %vm325_vm1 }
 0x1c5   :  { %v320_v1 = vmul.f32 %v988_v38, %v319_v0  ;;  %v1400_v2 = vpop.permute.xlu2 %774 }
 0x1c7   :  { %v321_v3 = vmul.f32 0.5, %v320_v1  ;;  %v197_v1 = vsel %vm34_vm0, %v159_v49, 0.0 }
 0x1c9   :  { %v322_v7 = vsub.f32 1.5, %v321_v3  ;;  %522 = vadd.xlane.f32.xlu1 %v521_v6 }
 0x1cb   :  { %v323_v8 = vmul.f32 %v988_v38, %v322_v7 }
 0x1cd   :  { %v327_v10 = vsel %vm326_vm3, %v988_v38, %v323_v8  ;;  %v463_v12 = vpop.permute.xlu2 %462 }
 0x1ce   :  { %v397_v17 = vmul.f32 %v327_v10, %v1202_v41  ;;  %v512_v18 = vsel %vm34_vm0, %v463_v12, 0.0  ;;  %v506_v41 = vsel %vm34_vm0, %v1320_v5, 0.0  ;;  %v542_v10 = vsel %vm34_vm0, %v1287_v40, 0.0 }
 0x1cf   :  { %v1428_v40 = vadd.f32 %v1164_v27, %v1348_v56 }
 0x1d0   :  { %v1408_v26 = vsel %vm34_vm0, %v397_v17, %v781_v51 }
 0x1d1   :  { %v196_v44 = vpop.xlane.xlu1 %195  ;;  %513 = vadd.xlane.f32.xlu1 %v512_v18 }
 0x1d2   :  { %v222_v3 = vmax.f32 %v196_v44, 1e-16 }
 0x1d4   :  { %vm334_vm7 = vweird.f32 %v222_v3 }
 0x1d9   :  { %v175_v47 = vpop.xlane.xlu1 %174 }
 0x1da   :  { %v215_v0 = vmax.f32 %v175_v47, 1e-16  ;;  %210 = vadd.xlane.f32.xlu0 %v209_v60  ;;  %v769_v60 = vpop.permute.xlu2 %768 }
 0x1dc   :  { %989 = vrsqrt.f32 %v215_v0  ;;  %vm264_vm4 = vweird.f32 %v215_v0 }
 0x1dd   :  { %991 = vrsqrt.f32 %v222_v3 }
 0x1e1   :  { %v187_v12 = vpop.xlane.xlu1 %186 }
 0x1e2   :  { %v990_v38 = vpop.eup %989  ;;  %507 = vadd.xlane.f32.xlu0 %v506_v41  ;;  %v219_v18 = vmax.f32 %v187_v12, 1e-16 }
 0x1e3   :  { %v259_v51 = vmul.f32 %v990_v38, %v215_v0  ;;  %vm265_vm5 = vweird.f32 %v990_v38  ;;  %v992_v47 = vpop.eup %991  ;;  %v533_v0 = vsel %vm34_vm0, %v1330_v29, 0.0 }
 0x1e4   :  { %198 = vadd.xlane.f32.xlu2 %v197_v1  ;;  %vm266_vm6 = vmor %vm264_vm4, %vm265_vm5  ;;  %993 = vrsqrt.f32 %v219_v18  ;;  %v329_v49 = vmul.f32 %v992_v47, %v222_v3  ;;  %v485_v1 = vpop.permute.xlu0 %484  ;;  %vm335_vm8 = vweird.f32 %v992_v47  ;;  %vm304_vm10 = vweird.f32 %v219_v18 }
 0x1e5   :  { %v260_v6 = vmul.f32 %v990_v38, %v259_v51  ;;  %vm336_vm9 = vmor %vm334_vm7, %vm335_vm8 }
 0x1e6   :  { %v330_v41 = vmul.f32 %v992_v47, %v329_v49 }
 0x1e7   :  { %v261_v7 = vmul.f32 0.5, %v260_v6 }
 0x1e8   :  { %v331_v6 = vmul.f32 0.5, %v330_v41 }
 0x1e9   :  { %v262_v8 = vsub.f32 1.5, %v261_v7 }
 0x1ea   :  { %543 = vadd.xlane.f32.xlu0 %v542_v10  ;;  %v332_v29 = vsub.f32 1.5, %v331_v6 }
 0x1eb   :  { %v263_v5 = vmul.f32 %v990_v38, %v262_v8  ;;  %v437_v8 = vmul.f32 %v1428_v40, %v1428_v40 }
 0x1ed   :  { %v267_v17 = vsel %vm266_vm6, %v990_v38, %v263_v5  ;;  %v994_v38 = vpop.eup %993  ;;  %v333_v5 = vmul.f32 %v992_v47, %v332_v29 }
 0x1ee   :  { %v391_v45 = vmul.f32 %v267_v17, %v1301_v48  ;;  %v524_v48 = vsel %vm34_vm0, %v471_v55, 0.0  ;;  %v299_v7 = vmul.f32 %v994_v38, %v219_v18  ;;  %vm305_vm11 = vweird.f32 %v994_v38 }
 0x1ef   :  { %vm306_vm12 = vmor %vm304_vm10, %vm305_vm11 }
 0x1f0   :  { %v1422_v44 = vsel %vm34_vm0, %v391_v45, %v769_v60  ;;  %v300_v10 = vmul.f32 %v994_v38, %v299_v7  ;;  %v337_v60 = vsel %vm336_vm9, %v992_v47, %v333_v5 }
 0x1f1   :  { %v398_v49 = vmul.f32 %v337_v60, %v1289_v43 }
 0x1f2   :  { %534 = vadd.xlane.f32.xlu0 %v533_v0  ;;  %v301_v17 = vmul.f32 0.5, %v300_v10  ;;  %v518_v10 = vsel %vm34_vm0, %v1298_v46, 0.0 }
 0x1f4   :  { %v302_v45 = vsub.f32 1.5, %v301_v17 }
 0x1f6   :  { %v303_v41 = vmul.f32 %v994_v38, %v302_v45 }
 0x1f7   :  { %v1437_v55 = vpop.xlane.xlu0 %183 }
 0x1f8   :  { %v307_v7 = vsel %vm306_vm12, %v994_v38, %v303_v41  ;;  %v545_v38 = vsel %vm34_vm0, %v485_v1, 0.0 }
 0x1f9   :  { %v465_v51 = vpop.permute.xlu1 %464 }
 0x1fa   :  { %525 = vadd.xlane.f32.xlu0 %v524_v48  ;;  %v515_v12 = vsel %vm34_vm0, %v465_v51, 0.0 }
 0x1fc   :  { %480 = vrot.lane.b32.xlu2 %v437_v8, %s1042_s0  ;;  %v395_v8 = vmul.f32 %v307_v7, %v1312_v59 }
 0x201   :  { %v1434_v27 = vpop.permute.xlu1 %784 }
 0x202   :  { %1666 = vst [vmem:[#allocation5_spill] sm:$0xff] %v1434_v27  ;;  %516 = vadd.xlane.f32.xlu0 %v515_v12  ;;  %v509_v12 = vsel %vm34_vm0, %v1332_v33, 0.0 }
 0x209   :  { %v489_v0 = vpop.permute.xlu1 %488 }
 0x20a   :  { %v783_v3 = vpop.permute.xlu0 %782  ;;  %v551_v48 = vsel %vm34_vm0, %v489_v0, 0.0 }
 0x20b   :  { %v1442_v51 = vsel %vm34_vm0, %v398_v49, %v783_v3  ;;  %552 = vadd.xlane.f32.xlu0 %v551_v48 }
 0x20e   :  { %v1444_v6 = vpop.xlane.xlu2 %207 }
 0x212   :  { %v777_v47 = vpop.permute.xlu0 %776 }
 0x213   :  { %v1448_v18 = vsel %vm34_vm0, %v395_v8, %v777_v47 }
 0x216   :  { %v487_v29 = vpop.permute.xlu2 %486 }
 0x217   :  { %v548_v43 = vsel %vm34_vm0, %v487_v29, 0.0 }
 0x218   :  { %549 = vadd.xlane.f32.xlu1 %v548_v43 }
 0x21a   :  { %v479_v59 = vpop.permute.xlu0 %478 }
 0x21b   :  { %v536_v60 = vsel %vm34_vm0, %v479_v59, 0.0 }
 0x222   :  { %v473_v41 = vpop.permute.xlu0 %472 }
 0x223   :  { %v527_v33 = vsel %vm34_vm0, %v473_v41, 0.0 }
 0x225   :  { %519 = vadd.xlane.f32.xlu2 %v518_v10  ;;  %v793_v10 = vpop.permute.xlu2 %792 }
 0x22d   :  { %510 = vadd.xlane.f32.xlu2 %v509_v12 }
 0x234   :  { %v532_v5 = vpop.xlane.xlu1 %531 }
 0x235   :  { %546 = vadd.xlane.f32.xlu2 %v545_v38  ;;  %v562_v17 = vmax.f32 %v532_v5, 1e-16 }
 0x237   :  { %995 = vrsqrt.f32 %v562_v17  ;;  %vm656_vm14 = vweird.f32 %v562_v17 }
 0x23c   :  { %v523_v45 = vpop.xlane.xlu1 %522 }
 0x23d   :  { %537 = vadd.xlane.f32.xlu2 %v536_v60  ;;  %v559_v0 = vmax.f32 %v523_v45, 1e-16  ;;  %v996_v49 = vpop.eup %995 }
 0x23e   :  { %v651_v46 = vmul.f32 %v996_v49, %v562_v17  ;;  %vm657_vm13 = vweird.f32 %v996_v49 }
 0x23f   :  { %997 = vrsqrt.f32 %v559_v0  ;;  %vm658_vm15 = vmor %vm656_vm14, %vm657_vm13  ;;  %vm626_vm3 = vweird.f32 %v559_v0 }
 0x240   :  { %v652_v1 = vmul.f32 %v996_v49, %v651_v46 }
 0x242   :  { %v653_v8 = vmul.f32 0.5, %v652_v1 }
 0x244   :  { %v514_v3 = vpop.xlane.xlu1 %513  ;;  %v654_v12 = vsub.f32 1.5, %v653_v8 }
 0x245   :  { %528 = vadd.xlane.f32.xlu2 %v527_v33  ;;  %v1458_v48 = vmax.f32 %v514_v3, 1e-16  ;;  %v998_v7 = vpop.eup %997 }
 0x246   :  { %v621_v47 = vmul.f32 %v998_v7, %v559_v0  ;;  %v655_v60 = vmul.f32 %v996_v49, %v654_v12  ;;  %vm627_vm1 = vweird.f32 %v998_v7 }
 0x247   :  { %999 = vrsqrt.f32 %v1458_v48  ;;  %vm628_vm4 = vmor %vm626_vm3, %vm627_vm1  ;;  %vm596_vm9 = vweird.f32 %v1458_v48 }
 0x248   :  { %v622_v5 = vmul.f32 %v998_v7, %v621_v47  ;;  %v659_v47 = vsel %vm658_vm15, %v996_v49, %v655_v60 }
 0x24a   :  { %v623_v59 = vmul.f32 0.5, %v622_v5  ;;  %v738_v5 = vmul.f32 %v659_v47, %v1228_v52 }
 0x24d   :  { %v211_v29 = vpop.xlane.xlu0 %210  ;;  %v1461_v38 = vpop.eup %999 }
 0x24e   :  { %v227_v43 = vmax.f32 %v211_v29, 1e-16  ;;  %v591_v45 = vmul.f32 %v1461_v38, %v1458_v48  ;;  %v624_v29 = vsub.f32 1.5, %v623_v59  ;;  %vm597_vm7 = vweird.f32 %v1461_v38 }
 0x24f   :  { %vm598_vm10 = vmor %vm596_vm9, %vm597_vm7 }
 0x250   :  { %1001 = vrsqrt.f32 %v227_v43  ;;  %v592_v8 = vmul.f32 %v1461_v38, %v591_v45  ;;  %v625_v12 = vmul.f32 %v998_v7, %v624_v29  ;;  %vm384_vm5 = vweird.f32 %v227_v43 }
 0x252   :  { %v593_v9 = vmul.f32 0.5, %v592_v8 }
 0x255   :  { %v508_v41 = vpop.xlane.xlu0 %507 }
 0x256   :  { %v1002_v46 = vpop.eup %1001  ;;  %v554_v3 = vmax.f32 %v508_v41, 1e-16 }
 0x257   :  { %v379_v33 = vmul.f32 %v1002_v46, %v227_v43  ;;  %v1465_v1 = vpop.xlane.xlu2 %198  ;;  %vm385_vm2 = vweird.f32 %v1002_v46 }
 0x258   :  { %1003 = vrsqrt.f32 %v554_v3  ;;  %vm386_vm6 = vmor %vm384_vm5, %vm385_vm2  ;;  %vm576_vm11 = vweird.f32 %v554_v3 }
 0x259   :  { %v380_v4 = vmul.f32 %v1002_v46, %v379_v33  ;;  %v629_v33 = vsel %vm628_vm4, %v998_v7, %v625_v12 }
 0x25a   :  { %v735_v0 = vmul.f32 %v629_v33, %v1278_v21 }
 0x25b   :  { %v381_v54 = vmul.f32 0.5, %v380_v4  ;;  %v594_v4 = vsub.f32 1.5, %v593_v9 }
 0x25d   :  { %v382_v27 = vsub.f32 1.5, %v381_v54  ;;  %v544_v17 = vpop.xlane.xlu0 %543  ;;  %842 = vrot.lane.b32.xlu2 %v738_v5, %s1043_s22 }
 0x25e   :  { %v1004_v41 = vpop.eup %1003  ;;  %v566_v59 = vmax.f32 %v544_v17, 1e-16 }
 0x25f   :  { %v383_v45 = vmul.f32 %v1002_v46, %v382_v27  ;;  %v571_v49 = vmul.f32 %v1004_v41, %v554_v3  ;;  %v481_v60 = vpop.permute.xlu2 %480  ;;  %v595_v27 = vmul.f32 %v1461_v38, %v594_v4  ;;  %vm577_vm8 = vweird.f32 %v1004_v41 }
 0x260   :  { %1005 = vrsqrt.f32 %v566_v59  ;;  %v539_v52 = vsel %vm34_vm0, %v481_v60, 0.0  ;;  %vm578_vm12 = vmor %vm576_vm11, %vm577_vm8  ;;  %vm696_vm14 = vweird.f32 %v566_v59 }
 0x261   :  { %v387_v54 = vsel %vm386_vm6, %v1002_v46, %v383_v45  ;;  %v572_v29 = vmul.f32 %v1004_v41, %v571_v49  ;;  %540 = vadd.xlane.f32.xlu1 %v539_v52  ;;  %v599_v12 = vsel %vm598_vm10, %v1461_v38, %v595_v27 }
 0x262   :  { %v403_v8 = vmul.f32 %v387_v54, %v1350_v58  ;;  %v732_v60 = vmul.f32 %v599_v12, %v1310_v57 }
 0x263   :  { %v573_v47 = vmul.f32 0.5, %v572_v29 }
 0x264   :  { %v1476_v43 = vsel %vm34_vm0, %v403_v8, %v793_v10 }
 0x265   :  { %v574_v9 = vsub.f32 1.5, %v573_v47  ;;  %v535_v5 = vpop.xlane.xlu0 %534  ;;  %836 = vrot.lane.b32.xlu2 %v735_v0, %s1043_s22 }
 0x266   :  { %v1006_v7 = vpop.eup %1005  ;;  %v563_v46 = vmax.f32 %v535_v5, 1e-16 }
 0x267   :  { %v691_v58 = vmul.f32 %v1006_v7, %v566_v59  ;;  %v575_v21 = vmul.f32 %v1004_v41, %v574_v9  ;;  %vm697_vm13 = vweird.f32 %v1006_v7 }
 0x268   :  { %1007 = vrsqrt.f32 %v563_v46  ;;  %vm698_vm15 = vmor %vm696_vm14, %vm697_vm13  ;;  %vm666_vm2 = vweird.f32 %v563_v46 }
 0x269   :  { %v692_v17 = vmul.f32 %v1006_v7, %v691_v58  ;;  %v579_v10 = vsel %vm578_vm12, %v1004_v41, %v575_v21 }
 0x26a   :  { %v730_v45 = vmul.f32 %v579_v10, %v1187_v35 }
 0x26b   :  { %v693_v49 = vmul.f32 0.5, %v692_v17 }
 0x26c   :  { %826 = vrot.lane.b32.xlu0 %v730_v45, %s1043_s22 }
 0x26d   :  { %v694_v4 = vsub.f32 1.5, %v693_v49  ;;  %v526_v48 = vpop.xlane.xlu0 %525  ;;  %830 = vrot.lane.b32.xlu2 %v732_v60, %s1043_s22 }
 0x26e   :  { %v1008_v3 = vpop.eup %1007  ;;  %v560_v52 = vmax.f32 %v526_v48, 1e-16 }
 0x26f   :  { %v661_v33 = vmul.f32 %v1008_v3, %v563_v46  ;;  %v695_v54 = vmul.f32 %v1006_v7, %v694_v4  ;;  %vm667_vm1 = vweird.f32 %v1008_v3 }
 0x270   :  { %1009 = vrsqrt.f32 %v560_v52  ;;  %vm668_vm3 = vmor %vm666_vm2, %vm667_vm1  ;;  %vm636_vm5 = vweird.f32 %v560_v52 }
 0x271   :  { %v662_v38 = vmul.f32 %v1008_v3, %v661_v33  ;;  %v699_v41 = vsel %vm698_vm15, %v1006_v7, %v695_v54 }
 0x272   :  { %v742_v35 = vmul.f32 %v699_v41, %v1170_v28 }
 0x273   :  { %v663_v29 = vmul.f32 0.5, %v662_v38 }
 0x274   :  { %850 = vrot.lane.b32.xlu0 %v742_v35, %s1043_s22 }
 0x275   :  { %v664_v57 = vsub.f32 1.5, %v663_v29  ;;  %v517_v8 = vpop.xlane.xlu0 %516 }
 0x276   :  { %v1010_v47 = vpop.eup %1009  ;;  %v557_v0 = vmax.f32 %v517_v8, 1e-16  ;;  %v220_v8 = vmax.f32 %v1366_v11, 1e-16 }
 0x277   :  { %v631_v27 = vmul.f32 %v1010_v47, %v560_v52  ;;  %v665_v9 = vmul.f32 %v1008_v3, %v664_v57  ;;  %vm637_vm4 = vweird.f32 %v1010_v47 }
 0x278   :  { %1011 = vrsqrt.f32 %v557_v0  ;;  %vm638_vm6 = vmor %vm636_vm5, %vm637_vm4  ;;  %vm606_vm8 = vweird.f32 %v557_v0  ;;  %vm314_vm5 = vweird.f32 %v220_v8 }
 0x279   :  { %v632_v59 = vmul.f32 %v1010_v47, %v631_v27  ;;  %v669_v5 = vsel %vm668_vm3, %v1008_v3, %v665_v9 }
 0x27a   :  { %v739_v58 = vmul.f32 %v669_v5, %v1206_v42 }
 0x27b   :  { %v633_v7 = vmul.f32 0.5, %v632_v59 }
 0x27c   :  { %844 = vrot.lane.b32.xlu0 %v739_v58, %s1043_s22 }
 0x27d   :  { %v634_v28 = vsub.f32 1.5, %v633_v7 }
 0x27e   :  { %v1012_v21 = vpop.eup %1011  ;;  %v553_v12 = vpop.xlane.xlu0 %552 }
 0x27f   :  { %v601_v17 = vmul.f32 %v1012_v21, %v557_v0  ;;  %v569_v10 = vmax.f32 %v553_v12, 1e-16  ;;  %v635_v45 = vmul.f32 %v1010_v47, %v634_v28  ;;  %vm607_vm7 = vweird.f32 %v1012_v21 }
 0x280   :  { %vm608_vm9 = vmor %vm606_vm8, %vm607_vm7 }
 0x281   :  { %v602_v46 = vmul.f32 %v1012_v21, %v601_v17  ;;  %1013 = vrsqrt.f32 %v569_v10  ;;  %v639_v49 = vsel %vm638_vm6, %v1010_v47, %v635_v45  ;;  %vm726_vm11 = vweird.f32 %v569_v10 }
 0x282   :  { %v736_v60 = vmul.f32 %v639_v49, %v1247_v63  ;;  %1015 = vrsqrt.f32 %v220_v8 }
 0x283   :  { %v603_v4 = vmul.f32 0.5, %v602_v46 }
 0x284   :  { %838 = vrot.lane.b32.xlu0 %v736_v60, %s1043_s22 }
 0x285   :  { %v604_v42 = vsub.f32 1.5, %v603_v4 }
 0x287   :  { %v1014_v48 = vpop.eup %1013  ;;  %v605_v3 = vmul.f32 %v1012_v21, %v604_v42 }
 0x288   :  { %v721_v33 = vmul.f32 %v1014_v48, %v569_v10  ;;  %vm727_vm10 = vweird.f32 %v1014_v48  ;;  %v1016_v27 = vpop.eup %1015 }
 0x289   :  { %v609_v52 = vsel %vm608_vm9, %v1012_v21, %v605_v3  ;;  %vm728_vm12 = vmor %vm726_vm11, %vm727_vm10  ;;  %v309_v5 = vmul.f32 %v1016_v27, %v220_v8  ;;  %vm315_vm2 = vweird.f32 %v1016_v27  ;;  %vm907_vm10 = vcmask 531456  }
 0x28a   :  { %v722_v54 = vmul.f32 %v1014_v48, %v721_v33  ;;  %v733_v38 = vmul.f32 %v609_v52, %v1338_v37  ;;  %v217_v37 = vmax.f32 %v1389_v22, 1e-16  ;;  %vm316_vm6 = vmor %vm314_vm5, %vm315_vm2  ;;  %vm890_vm11 = vcmask 523264  }
 0x28c   :  { %v723_v41 = vmul.f32 0.5, %v722_v54  ;;  %832 = vrot.lane.b32.xlu0 %v733_v38, %s1043_s22  ;;  %vm284_vm8 = vweird.f32 %v217_v37 }
 0x28e   :  { %v724_v35 = vsub.f32 1.5, %v723_v41 }
 0x290   :  { %v725_v63 = vmul.f32 %v1014_v48, %v724_v35 }
 0x292   :  { %v729_v29 = vsel %vm728_vm12, %v1014_v48, %v725_v63  ;;  %vm924_vm12 = vcmask 793600  }
 0x293   :  { %v745_v57 = vmul.f32 %v729_v29, %v1356_v62  ;;  %v310_v62 = vmul.f32 %v1016_v27, %v309_v5 }
 0x295   :  { %856 = vrot.lane.b32.xlu0 %v745_v57, %s1043_s22  ;;  %v311_v45 = vmul.f32 0.5, %v310_v62 }
 0x297   :  { %v312_v48 = vsub.f32 1.5, %v311_v45 }
 0x298   :  { %v520_v47 = vpop.xlane.xlu2 %519 }
 0x299   :  { %v558_v0 = vmax.f32 %v520_v47, 1e-16  ;;  %v313_v35 = vmul.f32 %v1016_v27, %v312_v48 }
 0x29b   :  { %1017 = vrsqrt.f32 %v558_v0  ;;  %vm616_vm14 = vweird.f32 %v558_v0  ;;  %v317_v47 = vsel %vm316_vm6, %v1016_v27, %v313_v35 }
 0x29c   :  { %1019 = vrsqrt.f32 %v217_v37  ;;  %v396_v5 = vmul.f32 %v317_v47, %v1152_v23  ;;  %v893_v47 = vsel %vm890_vm11, %v1370_v14, 1.0 }
 0x2a0   :  { %v511_v9 = vpop.xlane.xlu2 %510 }
 0x2a1   :  { %v1018_v59 = vpop.eup %1017  ;;  %v555_v58 = vmax.f32 %v511_v9, 1e-16 }
 0x2a2   :  { %v611_v7 = vmul.f32 %v1018_v59, %v558_v0  ;;  %v1497_v11 = vpop.eup %1019  ;;  %vm617_vm13 = vweird.f32 %v1018_v59 }
 0x2a3   :  { %1021 = vrsqrt.f32 %v555_v58  ;;  %v279_v22 = vmul.f32 %v1497_v11, %v217_v37  ;;  %vm618_vm15 = vmor %vm616_vm14, %vm617_vm13  ;;  %vm586_vm3 = vweird.f32 %v555_v58  ;;  %vm285_vm7 = vweird.f32 %v1497_v11 }
 0x2a4   :  { %v612_v28 = vmul.f32 %v1018_v59, %v611_v7  ;;  %vm286_vm9 = vmor %vm284_vm8, %vm285_vm7 }
 0x2a5   :  { %v280_v3 = vmul.f32 %v1497_v11, %v279_v22 }
 0x2a6   :  { %v613_v21 = vmul.f32 0.5, %v612_v28 }
 0x2a7   :  { %v281_v63 = vmul.f32 0.5, %v280_v3 }
 0x2a8   :  { %v614_v12 = vsub.f32 1.5, %v613_v21  ;;  %v547_v17 = vpop.xlane.xlu2 %546 }
 0x2a9   :  { %v1022_v10 = vpop.eup %1021  ;;  %v1503_v38 = vmax.f32 %v547_v17, 1e-16  ;;  %v282_v0 = vsub.f32 1.5, %v281_v63 }
 0x2aa   :  { %v581_v46 = vmul.f32 %v1022_v10, %v555_v58  ;;  %v615_v49 = vmul.f32 %v1018_v59, %v614_v12  ;;  %vm587_vm1 = vweird.f32 %v1022_v10 }
 0x2ab   :  { %vm588_vm4 = vmor %vm586_vm3, %vm587_vm1  ;;  %v283_v58 = vmul.f32 %v1497_v11, %v282_v0  ;;  %vm706_vm5 = vweird.f32 %v1503_v38 }
 0x2ac   :  { %v582_v60 = vmul.f32 %v1022_v10, %v581_v46  ;;  %v619_v4 = vsel %vm618_vm15, %v1018_v59, %v615_v49 }
 0x2ad   :  { %v734_v42 = vmul.f32 %v619_v4, %v1183_v34  ;;  %v287_v27 = vsel %vm286_vm9, %v1497_v11, %v283_v58 }
 0x2ae   :  { %v583_v33 = vmul.f32 0.5, %v582_v60  ;;  %v393_v45 = vmul.f32 %v287_v27, %v1160_v25 }
 0x2af   :  { %834 = vrot.lane.b32.xlu1 %v734_v42, %s1043_s22 }
 0x2b0   :  { %v584_v52 = vsub.f32 1.5, %v583_v33  ;;  %v538_v54 = vpop.xlane.xlu2 %537  ;;  %v879_v25 = vsel %vm34_vm0, %v393_v45, %v1274_v36 }
 0x2b1   :  { %v564_v41 = vmax.f32 %v538_v54, 1e-16  ;;  %v896_v33 = vsel %vm890_vm11, %v879_v25, 1.0 }
 0x2b2   :  { %v585_v29 = vmul.f32 %v1022_v10, %v584_v52 }
 0x2b3   :  { %1023 = vrsqrt.f32 %v564_v41  ;;  %vm676_vm14 = vweird.f32 %v564_v41 }
 0x2b4   :  { %v589_v34 = vsel %vm588_vm4, %v1022_v10, %v585_v29  ;;  %1025 = vrsqrt.f32 %v1503_v38 }
 0x2b5   :  { %v731_v57 = vmul.f32 %v589_v34, %v1222_v50  ;;  %v882_v50 = vsel %vm34_vm0, %v396_v5, %v1258_v15 }
 0x2b6   :  { %v899_v17 = vsel %vm890_vm11, %v882_v50, 1.0 }
 0x2b7   :  { %828 = vrot.lane.b32.xlu1 %v731_v57, %s1043_s22 }
 0x2b8   :  { %v529_v9 = vpop.xlane.xlu2 %528 }
 0x2b9   :  { %v1024_v59 = vpop.eup %1023  ;;  %v561_v7 = vmax.f32 %v529_v9, 1e-16 }
 0x2ba   :  { %v671_v8 = vmul.f32 %v1024_v59, %v564_v41  ;;  %v1511_v28 = vpop.eup %1025  ;;  %vm677_vm13 = vweird.f32 %v1024_v59  ;;  %v550_v41 = vpop.xlane.xlu1 %549 }
 0x2bb   :  { %1027 = vrsqrt.f32 %v561_v7  ;;  %v701_v23 = vmul.f32 %v1511_v28, %v1503_v38  ;;  %vm678_vm15 = vmor %vm676_vm14, %vm677_vm13  ;;  %vm646_vm2 = vweird.f32 %v561_v7  ;;  %v568_v29 = vmax.f32 %v550_v41, 1e-16 }
 0x2bc   :  { %v672_v62 = vmul.f32 %v1024_v59, %v671_v8  ;;  %vm707_vm4 = vweird.f32 %v1511_v28 }
 0x2bd   :  { %v702_v15 = vmul.f32 %v1511_v28, %v701_v23  ;;  %vm708_vm6 = vmor %vm706_vm5, %vm707_vm4  ;;  %v891_v23 = vsel %vm890_vm11, %v1267_v31, 1.0  ;;  %v903_v31 = vsel %vm890_vm11, %v1328_v19, 1.0 }
 0x2be   :  { %v673_v21 = vmul.f32 0.5, %v672_v62 }
 0x2bf   :  { %v703_v42 = vmul.f32 0.5, %v702_v15 }
 0x2c0   :  { %v674_v12 = vsub.f32 1.5, %v673_v21  ;;  %v843_v10 = vpop.permute.xlu2 %842 }
 0x2c1   :  { %v1028_v37 = vpop.eup %1027  ;;  %v916_v22 = vsel %vm907_vm10, %v899_v17, %v843_v10  ;;  %v704_v35 = vsub.f32 1.5, %v703_v42  ;;  %v900_v42 = vsel %vm890_vm11, %v1408_v26, 1.0 }
 0x2c2   :  { %v641_v11 = vmul.f32 %v1028_v37, %v561_v7  ;;  %933 = vst.msk [vmem:[%s1661_s3 + $0x40] sm:$0xff] %vm924_vm12, %v916_v22  ;;  %v675_v46 = vmul.f32 %v1024_v59, %v674_v12  ;;  %vm647_vm1 = vweird.f32 %v1028_v37 }
 0x2c3   :  { %vm648_vm3 = vmor %vm646_vm2, %vm647_vm1  ;;  %v705_v57 = vmul.f32 %v1511_v28, %v704_v35  ;;  %vm716_vm2 = vweird.f32 %v568_v29 }
 0x2c4   :  { %v642_v49 = vmul.f32 %v1028_v37, %v641_v11  ;;  %v679_v60 = vsel %vm678_vm15, %v1024_v59, %v675_v46 }
 0x2c5   :  { %v740_v4 = vmul.f32 %v679_v60, %v1376_v16  ;;  %v218_v16 = vmax.f32 %v1437_v55, 1e-16 }
 0x2c6   :  { %v643_v48 = vmul.f32 0.5, %v642_v49 }
 0x2c7   :  { %846 = vrot.lane.b32.xlu1 %v740_v4, %s1043_s22  ;;  %1029 = vrsqrt.f32 %v218_v16  ;;  %vm294_vm14 = vweird.f32 %v218_v16 }
 0x2c8   :  { %v644_v3 = vsub.f32 1.5, %v643_v48  ;;  %v837_v52 = vpop.permute.xlu2 %836  ;;  %1031 = vrsqrt.f32 %v568_v29 }
 0x2c9   :  { %v913_v54 = vsel %vm907_vm10, %v896_v33, %v837_v52 }
 0x2ca   :  { %930 = vst.msk [vmem:[%s1661_s3 + $0x28] sm:$0xff] %vm924_vm12, %v913_v54  ;;  %v645_v36 = vmul.f32 %v1028_v37, %v644_v3 }
 0x2cc   :  { %v649_v63 = vsel %vm648_vm3, %v1028_v37, %v645_v36 }
 0x2cd   :  { %v737_v34 = vmul.f32 %v649_v63, %v1383_v53  ;;  %v709_v53 = vsel %vm708_vm6, %v1511_v28, %v705_v57  ;;  %v1030_v59 = vpop.eup %1029 }
 0x2ce   :  { %v743_v7 = vmul.f32 %v709_v53, %v1285_v39  ;;  %v1032_v14 = vpop.eup %1031  ;;  %v289_v38 = vmul.f32 %v1030_v59, %v218_v16  ;;  %vm295_vm13 = vweird.f32 %v1030_v59  ;;  %v895_v53 = vsel %vm890_vm11, %v1264_v30, 1.0 }
 0x2cf   :  { %840 = vrot.lane.b32.xlu1 %v737_v34, %s1043_s22  ;;  %v711_v58 = vmul.f32 %v1032_v14, %v568_v29  ;;  %vm717_vm15 = vweird.f32 %v1032_v14  ;;  %vm296_vm1 = vmor %vm294_vm14, %vm295_vm13 }
 0x2d0   :  { %v831_v0 = vpop.permute.xlu2 %830  ;;  %v290_v8 = vmul.f32 %v1030_v59, %v289_v38  ;;  %vm718_vm3 = vmor %vm716_vm2, %vm717_vm15 }
 0x2d1   :  { %v910_v55 = vsel %vm907_vm10, %v893_v47, %v831_v0  ;;  %v712_v50 = vmul.f32 %v1032_v14, %v711_v58  ;;  %v223_v0 = vmax.f32 %v1465_v1, 1e-16 }
 0x2d2   :  { %927 = vst.msk [vmem:[%s1661_s3 + $0x10] sm:$0xff] %vm924_vm12, %v910_v55  ;;  %v291_v12 = vmul.f32 0.5, %v290_v8 }
 0x2d3   :  { %v713_v39 = vmul.f32 0.5, %v712_v50 }
 0x2d4   :  { %v541_v9 = vpop.xlane.xlu1 %540  ;;  %v292_v37 = vsub.f32 1.5, %v291_v12 }
 0x2d5   :  { %v565_v5 = vmax.f32 %v541_v9, 1e-16  ;;  %v714_v22 = vsub.f32 1.5, %v713_v39 }
 0x2d6   :  { %v293_v49 = vmul.f32 %v1030_v59, %v292_v37 }
 0x2d7   :  { %1033 = vrsqrt.f32 %v565_v5  ;;  %852 = vrot.lane.b32.xlu1 %v743_v7, %s1043_s22  ;;  %vm686_vm8 = vweird.f32 %v565_v5  ;;  %v715_v25 = vmul.f32 %v1032_v14, %v714_v22 }
 0x2d8   :  { %v297_v19 = vsel %vm296_vm1, %v1030_v59, %v293_v49 }
 0x2d9   :  { %v719_v3 = vsel %vm718_vm3, %v1032_v14, %v715_v25  ;;  %v394_v33 = vmul.f32 %v297_v19, %v1243_v61  ;;  %v213_v61 = vmax.f32 %v1324_v13, 1e-16  ;;  %v1669_v25 = vld [vmem:[#allocation3_spill] sm:$0xff] }
 0x2da   :  { %v904_v19 = vsel %vm890_vm11, %v1669_v25, 1.0 }
 0x2db   :  { %v880_v54 = vsel %vm34_vm0, %v394_v33, %v1400_v2  ;;  %1035 = vrsqrt.f32 %v213_v61  ;;  %v906_v2 = vsel %vm890_vm11, %v1476_v43, 1.0  ;;  %vm244_vm5 = vweird.f32 %v213_v61 }
 0x2dc   :  { %v897_v26 = vsel %vm890_vm11, %v880_v54, 1.0  ;;  %1037 = vrsqrt.f32 %v223_v0 }
 0x2dd   :  { %v1034_v62 = vpop.eup %1033 }
 0x2de   :  { %v681_v27 = vmul.f32 %v1034_v62, %v565_v5  ;;  %v827_v21 = vpop.permute.xlu0 %826  ;;  %vm687_vm7 = vweird.f32 %v1034_v62  ;;  %v226_v5 = vmax.f32 %v1444_v6, 1e-16 }
 0x2df   :  { %v908_v28 = vsel %vm907_vm10, %v891_v23, %v827_v21  ;;  %vm688_vm9 = vmor %vm686_vm8, %vm687_vm7  ;;  %vm344_vm8 = vweird.f32 %v223_v0 }
 0x2e0   :  { %v682_v17 = vmul.f32 %v1034_v62, %v681_v27  ;;  %925 = vst.msk [vmem:[%s1661_s3] sm:$0xff] %vm924_vm12, %v908_v28  ;;  %1039 = vrsqrt.f32 %v226_v5  ;;  %vm374_vm14 = vweird.f32 %v226_v5 }
 0x2e1   :  { %v1036_v29 = vpop.eup %1035 }
 0x2e2   :  { %v683_v10 = vmul.f32 0.5, %v682_v17  ;;  %v239_v13 = vmul.f32 %v1036_v29, %v213_v61  ;;  %vm245_vm4 = vweird.f32 %v1036_v29  ;;  %v1038_v1 = vpop.eup %1037 }
 0x2e3   :  { %vm246_vm6 = vmor %vm244_vm5, %vm245_vm4  ;;  %v339_v38 = vmul.f32 %v1038_v1, %v223_v0  ;;  %vm345_vm7 = vweird.f32 %v1038_v1 }
 0x2e4   :  { %v684_v45 = vsub.f32 1.5, %v683_v10 }
 0x2e5   :  { %v340_v8 = vmul.f32 %v1038_v1, %v339_v38 }
 0x2e6   :  { %v851_v15 = vpop.permute.xlu0 %850  ;;  %v685_v11 = vmul.f32 %v1034_v62, %v684_v45  ;;  %v1040_v6 = vpop.eup %1039 }
 0x2e7   :  { %v920_v46 = vsel %vm907_vm10, %v903_v31, %v851_v15  ;;  %v341_v50 = vmul.f32 0.5, %v340_v8  ;;  %vm375_vm13 = vweird.f32 %v1040_v6  ;;  %v1667_v15 = vld [vmem:[#allocation5_spill] sm:$0xff] }
 0x2e8   :  { %937 = vst.msk [vmem:[%s1661_s3 + $0x60] sm:$0xff] %vm924_vm12, %v920_v46  ;;  %v689_v60 = vsel %vm688_vm9, %v1034_v62, %v685_v11  ;;  %v369_v62 = vmul.f32 %v1040_v6, %v226_v5  ;;  %vm346_vm9 = vmor %vm344_vm8, %vm345_vm7 }
 0x2e9   :  { %v741_v4 = vmul.f32 %v689_v60, %v1428_v40  ;;  %v744_v40 = vmul.f32 %v719_v3, %v1387_v20  ;;  %v894_v20 = vsel %vm890_vm11, %v1422_v44, 1.0  ;;  %v240_v44 = vmul.f32 %v1036_v29, %v239_v13  ;;  %vm376_vm15 = vmor %vm374_vm14, %vm375_vm13  ;;  %v1668_v60 = vld [vmem:[#allocation2_spill] sm:$0xff]  ;;  %v1670_v3 = vld [vmem:[#allocation4_spill] sm:$0xff] }
 0x2ea   :  { %v370_v27 = vmul.f32 %v1040_v6, %v369_v62  ;;  %v342_v23 = vsub.f32 1.5, %v341_v50 }
 0x2eb   :  { %848 = vrot.lane.b32.xlu2 %v741_v4, %s1043_s22  ;;  %v241_v57 = vmul.f32 0.5, %v240_v44 }
 0x2ec   :  { %v371_v21 = vmul.f32 0.5, %v370_v27  ;;  %v343_v28 = vmul.f32 %v1038_v1, %v342_v23 }
 0x2ed   :  { %v242_v47 = vsub.f32 1.5, %v241_v57 }
 0x2ee   :  { %v845_v48 = vpop.permute.xlu0 %844  ;;  %v372_v39 = vsub.f32 1.5, %v371_v21  ;;  %v347_v10 = vsel %vm346_vm9, %v1038_v1, %v343_v28 }
 0x2ef   :  { %v917_v52 = vsel %vm907_vm10, %v900_v42, %v845_v48  ;;  %v243_v55 = vmul.f32 %v1036_v29, %v242_v47  ;;  %v399_v37 = vmul.f32 %v347_v10, %v1348_v56 }
 0x2f0   :  { %934 = vst.msk [vmem:[%s1661_s3 + $0x48] sm:$0xff] %vm924_vm12, %v917_v52  ;;  %v373_v45 = vmul.f32 %v1040_v6, %v372_v39 }
 0x2f1   :  { %v247_v43 = vsel %vm246_vm6, %v1036_v29, %v243_v55  ;;  %v885_v11 = vsel %vm34_vm0, %v399_v37, %v1667_v15 }
 0x2f2   :  { %v389_v59 = vmul.f32 %v247_v43, %v1156_v24  ;;  %v377_v46 = vsel %vm376_vm15, %v1040_v6, %v373_v45  ;;  %v902_v56 = vsel %vm890_vm11, %v885_v11, 1.0 }
 0x2f3   :  { %854 = vrot.lane.b32.xlu2 %v744_v40, %s1043_s22  ;;  %v402_v4 = vmul.f32 %v377_v46, %v1668_v60 }
 0x2f4   :  { %v875_v14 = vsel %vm34_vm0, %v389_v59, %v1269_v32  ;;  %v901_v32 = vsel %vm890_vm11, %v1442_v51, 1.0  ;;  %v898_v51 = vsel %vm890_vm11, %v1448_v18, 1.0 }
 0x2f5   :  { %v892_v30 = vsel %vm890_vm11, %v875_v14, 1.0  ;;  %v888_v33 = vsel %vm34_vm0, %v402_v4, %v1670_v3 }
 0x2f6   :  { %v839_v41 = vpop.permute.xlu0 %838  ;;  %v905_v52 = vsel %vm890_vm11, %v888_v33, 1.0 }
 0x2f7   :  { %v914_v35 = vsel %vm907_vm10, %v897_v26, %v839_v41 }
 0x2f8   :  { %931 = vst.msk [vmem:[%s1661_s3 + $0x30] sm:$0xff] %vm924_vm12, %v914_v35 }
 0x2fe   :  { %v833_v36 = vpop.permute.xlu0 %832 }
 0x2ff   :  { %v911_v16 = vsel %vm907_vm10, %v894_v20, %v833_v36 }
 0x300   :  { %928 = vst.msk [vmem:[%s1661_s3 + $0x18] sm:$0xff] %vm924_vm12, %v911_v16 }
 0x307   :  { %v857_v63 = vpop.permute.xlu0 %856 }
 0x308   :  { %v923_v34 = vsel %vm907_vm10, %v906_v2, %v857_v63 }
 0x309   :  { %940 = vst.msk [vmem:[%s1661_s3 + $0x78] sm:$0xff] %vm924_vm12, %v923_v34 }
 0x321   :  { %v835_v9 = vpop.permute.xlu1 %834 }
 0x322   :  { %v912_v7 = vsel %vm907_vm10, %v895_v53, %v835_v9 }
 0x323   :  { %929 = vst.msk [vmem:[%s1661_s3 + $0x20] sm:$0xff] %vm924_vm12, %v912_v7 }
 0x329   :  { %v829_v58 = vpop.permute.xlu1 %828 }
 0x32a   :  { %v909_v24 = vsel %vm907_vm10, %v892_v30, %v829_v58 }
 0x32b   :  { %926 = vst.msk [vmem:[%s1661_s3 + $0x8] sm:$0xff] %vm924_vm12, %v909_v24 }
 0x339   :  { %v847_v12 = vpop.permute.xlu1 %846 }
 0x33a   :  { %v918_v17 = vsel %vm907_vm10, %v901_v32, %v847_v12 }
 0x33b   :  { %935 = vst.msk [vmem:[%s1661_s3 + $0x50] sm:$0xff] %vm924_vm12, %v918_v17 }
 0x341   :  { %v841_v22 = vpop.permute.xlu1 %840 }
 0x342   :  { %v915_v31 = vsel %vm907_vm10, %v898_v51, %v841_v22 }
 0x343   :  { %932 = vst.msk [vmem:[%s1661_s3 + $0x38] sm:$0xff] %vm924_vm12, %v915_v31 }
 0x345   :  { %v849_v49 = vpop.permute.xlu2 %848 }
 0x346   :  { %v919_v18 = vsel %vm907_vm10, %v902_v56, %v849_v49 }
 0x347   :  { %936 = vst.msk [vmem:[%s1661_s3 + $0x58] sm:$0xff] %vm924_vm12, %v919_v18 }
 0x349   :  { %v853_v42 = vpop.permute.xlu1 %852 }
 0x34a   :  { %v921_v48 = vsel %vm907_vm10, %v904_v19, %v853_v42 }
 0x34b   :  { %938 = vst.msk [vmem:[%s1661_s3 + $0x68] sm:$0xff] %vm924_vm12, %v921_v48 }
 0x34d   :  { %v855_v40 = vpop.permute.xlu2 %854 }
 0x34e   :  { %v922_v54 = vsel %vm907_vm10, %v905_v52, %v855_v40 }
 0x34f   :  { %939 = vst.msk [vmem:[%s1661_s3 + $0x70] sm:$0xff] %vm924_vm12, %v922_v54 }

</bundles_post_ra>
